<compile_context>
chip_gen: v7x
topology: tpu7x:2x2x1
jax: 0.10.0
libtpu: 0.0.40
codegen_flags: <defaults>
</compile_context>

<pallas_src>
import functools

import jax
import jax.numpy as jnp
from jax.experimental import pallas as pl
from jax.experimental.pallas import tpu as pltpu

# ----------------------------------------------------------------------------
# Model dimensions (synthetic, small)
# ----------------------------------------------------------------------------

PARAM_DIM = 64              # flattened model-parameter representation fed to Extractor
FEATURE_DIMS = (64, 32)     # Extractor output sizes; feature_dims[-1] == in_dim
INPUT_DIM = 256             # Reconstructor output (flattened reconstructed input)
RECON_HIDDEN = 4 * FEATURE_DIMS[-1]   # 128
NUM_CLASSES = 10
BATCH = 64                  # multiple of 8 so h[:B]/h[B:] is a free f32-tile slice
BN_EPS = 1e-5

LANES = INPUT_DIM           # widest lane extent in the packed slabs (256)

# Static row offsets inside the packed bf16 weight slab (all multiples of 16,
# so every slice is bf16 sublane-tile aligned).
_W0_OFF = 0                                   # [PARAM_DIM, F0]
_W1_OFF = _W0_OFF + PARAM_DIM                 # [F0, F]
_WMO_OFF = _W1_OFF + FEATURE_DIMS[0]          # [F, F]   (mapping, old half)
_WMN_OFF = _WMO_OFF + FEATURE_DIMS[1]         # [F, F]   (mapping, new half)
_WR1_OFF = _WMN_OFF + FEATURE_DIMS[1]         # [F, RECON_HIDDEN]
_WR2_OFF = _WR1_OFF + FEATURE_DIMS[1]         # [RECON_HIDDEN, INPUT_DIM]
_W_ROWS = _WR2_OFF + RECON_HIDDEN             # 352


# ----------------------------------------------------------------------------
# Fused Pallas kernel: entire Attacker forward in one invocation
# ----------------------------------------------------------------------------


def _attacker_fused_kernel(x_ref, w_ref, v_ref, o_ref, *, batch, eps):
    """x_ref: [2B, PARAM_DIM] f32 (old rows then new rows)
       w_ref: [352, 256] bf16 packed weight slab
       v_ref: [B+8, 256] f32 packed vectors (lab rows, then biases/BN affine)
       o_ref: [B, INPUT_DIM] f32 output."""
    f32 = jnp.float32
    bf16 = jnp.bfloat16
    f0, f = FEATURE_DIMS
    hr = RECON_HIDDEN

    # Packed per-row vectors (static slices -> masked vreg loads, no copies).
    lab = v_ref[0:batch, :f]                        # [B, F] label embedding
    b0 = v_ref[batch + 0:batch + 1, :f0]
    b1 = v_ref[batch + 1:batch + 2, :f]
    bm = v_ref[batch + 2:batch + 3, :f]
    gamma = v_ref[batch + 3:batch + 4, :f]
    beta = v_ref[batch + 4:batch + 5, :f]
    br1 = v_ref[batch + 5:batch + 6, :hr]
    br2 = v_ref[batch + 6:batch + 7, :INPUT_DIM]

    # --- Extractor, run once on the pre-stacked [2B, PARAM_DIM] tile ---------
    x = x_ref[...].astype(bf16)
    h = jnp.dot(x, w_ref[_W0_OFF:_W0_OFF + PARAM_DIM, :f0],
                preferred_element_type=f32) + b0
    h = jnp.maximum(h, 0.0)
    h = jnp.dot(h.astype(bf16), w_ref[_W1_OFF:_W1_OFF + f0, :f],
                preferred_element_type=f32) + b1
    h = jnp.maximum(h, 0.0)                          # [2B, F] f32

    f_old = h[:batch, :].astype(bf16)                # free split: B multiple of 8
    f_new = h[batch:, :].astype(bf16)

    # --- concat branch: cat([f_old, f_new]) @ W == f_old@W_old + f_new@W_new -
    y = (jnp.dot(f_old, w_ref[_WMO_OFF:_WMO_OFF + f, :f], preferred_element_type=f32)
         + jnp.dot(f_new, w_ref[_WMN_OFF:_WMN_OFF + f, :f], preferred_element_type=f32)
         + bm)

    # BatchNorm1d (training mode), single-pass statistics, all f32 on the VPU.
    # TODO(synk): eval-mode running_mean/running_var is not modeled.
    inv_b = 1.0 / batch
    mean = jnp.sum(y, axis=0, keepdims=True) * inv_b
    ex2 = jnp.sum(y * y, axis=0, keepdims=True) * inv_b
    var = ex2 - mean * mean
    mapped = jnp.maximum((y - mean) * jax.lax.rsqrt(var + eps) * gamma + beta, 0.0)

    # --- Reconstructor (label-conditioned MLP) --------------------------------
    z = (mapped + lab).astype(bf16)
    h2 = jnp.dot(z, w_ref[_WR1_OFF:_WR1_OFF + f, :hr],
                 preferred_element_type=f32) + br1
    h2 = jnp.maximum(h2, 0.0)
    out = jnp.dot(h2.astype(bf16), w_ref[_WR2_OFF:_WR2_OFF + hr, :INPUT_DIM],
                  preferred_element_type=f32) + br2

    o_ref[...] = out.astype(o_ref.dtype)             # [B, 256] lane-dense store


# ----------------------------------------------------------------------------
# Host-side packing of the weight / vector slabs
# ----------------------------------------------------------------------------


def _pack_weight_slab(w0, w1, wm_old, wm_new, wr1, wr2):
    def pad_cols(w):
        return jnp.pad(w, ((0, 0), (0, LANES - w.shape[1])))
    slab = jnp.concatenate(
        [pad_cols(w0), pad_cols(w1), pad_cols(wm_old), pad_cols(wm_new),
         pad_cols(wr1), pad_cols(wr2)], axis=0)
    assert slab.shape == (_W_ROWS, LANES)
    return slab.astype(jnp.bfloat16)


def _pack_vector_slab(lab, b0, b1, bm, gamma, beta, br1, br2):
    def row(v):
        return jnp.pad(v, (0, LANES - v.shape[0])).reshape(1, LANES)
    batch = lab.shape[0]
    rows = [jnp.pad(lab, ((0, 0), (0, LANES - lab.shape[1])))]
    rows += [row(b0), row(b1), row(bm), row(gamma), row(beta), row(br1), row(br2)]
    pad_rows = (-(batch + 7)) % 8
    if pad_rows:
        rows.append(jnp.zeros((pad_rows, LANES), jnp.float32))
    return jnp.concatenate(rows, axis=0).astype(jnp.float32)


# ----------------------------------------------------------------------------
# Parameter construction (deterministic, synthetic)
# ----------------------------------------------------------------------------


def _dense_init(key, fan_in, fan_out, scale=0.1):
    kw, kb = jax.random.split(key)
    w = scale * jax.random.normal(kw, (fan_in, fan_out), jnp.float32)
    b = scale * jax.random.normal(kb, (fan_out,), jnp.float32)
    return w, b


def make_params(key):
    keys = jax.random.split(key, 8)
    params = {}

    # TODO(synk): Extractor definition is not provided in the source file;
    # realized here as an MLP PARAM_DIM -> feature_dims[0] -> feature_dims[1]
    # with ReLU after each layer.
    dims = (PARAM_DIM,) + FEATURE_DIMS
    params["extractor"] = [
        _dense_init(keys[i], dims[i], dims[i + 1]) for i in range(len(FEATURE_DIMS))
    ]

    # linear_mapping = Linear(2F, F) + BatchNorm1d(F) + ReLU
    f = FEATURE_DIMS[-1]
    w, b = _dense_init(keys[3], 2 * f, f)
    gamma = jnp.ones((f,), jnp.float32)
    beta = jnp.zeros((f,), jnp.float32)
    params["mapping"] = (w, b, gamma, beta)

    # TODO(synk): Reconstructor definition is not provided in the source file;
    # realized as label-conditioned MLP: feat + Emb(y) -> 4*F -> INPUT_DIM.
    params["label_emb"] = _dense_init(keys[4], NUM_CLASSES, f)
    params["recon"] = [
        _dense_init(keys[5], f, RECON_HIDDEN),
        _dense_init(keys[6], RECON_HIDDEN, INPUT_DIM),
    ]
    return params


# ----------------------------------------------------------------------------
# Attacker forward (delta=False, concat=True path of the PyTorch module)
# ----------------------------------------------------------------------------


@jax.jit
def attacker_forward(params, param_old, param_new, y):
    f = FEATURE_DIMS[-1]
    B = param_old.shape[0]

    (w0, b0), (w1, b1) = params["extractor"]
    wm, bm, gamma, beta = params["mapping"]
    lw, lb = params["label_emb"]
    (wr1, br1), (wr2, br2) = params["recon"]

    # TODO(synk): torch.no_grad() on the old-extractor path only affects
    # gradients; stop_gradient documents the intent, forward is identical.
    param_old = jax.lax.stop_gradient(param_old)

    # Pre-stack old/new outside the kernel (single contiguous input tile).
    x_stack = jnp.concatenate([param_old, param_new], axis=0)     # [2B, PARAM_DIM]

    # Label embedding as a row gather (instead of one-hot @ W matmul).
    lab = jnp.take(lw, y, axis=0) + lb                            # [B, F]

    w_slab = _pack_weight_slab(w0, w1, wm[:f, :], wm[f:, :], wr1, wr2)
    v_slab = _pack_vector_slab(lab, b0, b1, bm, gamma, beta, br1, br2)

    kernel = functools.partial(_attacker_fused_kernel, batch=B, eps=BN_EPS)
    return pl.pallas_call(
        kernel,
        out_shape=jax.ShapeDtypeStruct((B, INPUT_DIM), jnp.float32),
        in_specs=[pl.BlockSpec(memory_space=pltpu.MemorySpace.VMEM)] * 3,
        out_specs=pl.BlockSpec(memory_space=pltpu.MemorySpace.VMEM),
    )(x_stack, w_slab, v_slab)


# ----------------------------------------------------------------------------
# Pure-JAX reference (mirrors the PyTorch forward) for correctness checking.
# mm_dtype=bfloat16 matches the kernel's MXU operand precision exactly.
# ----------------------------------------------------------------------------


def reference_forward(params, param_old, param_new, y, eps=BN_EPS,
                      mm_dtype=jnp.float32):
    def mm(a, w):
        return jnp.dot(a.astype(mm_dtype), w.astype(mm_dtype),
                       preferred_element_type=jnp.float32)

    def extract(x):
        h = x
        for w, b in params["extractor"]:
            h = jnp.maximum(mm(h, w) + b, 0.0)
        return h

    f_old = extract(param_old)
    f_new = extract(param_new)
    cat = jnp.concatenate([f_old, f_new], axis=1)
    w, b, gamma, beta = params["mapping"]
    yv = mm(cat, w) + b
    mean = jnp.mean(yv, axis=0, keepdims=True)
    var = jnp.mean(jnp.square(yv - mean), axis=0, keepdims=True)
    mapped = jnp.maximum((yv - mean) * jax.lax.rsqrt(var + eps) * gamma + beta, 0.0)
    lw, lb = params["label_emb"]
    lab = jax.nn.one_hot(y, NUM_CLASSES, dtype=jnp.float32) @ lw + lb
    z = mapped + lab
    (w1, b1), (w2, b2) = params["recon"]
    h = jnp.maximum(mm(z, w1) + b1, 0.0)
    return mm(h, w2) + b2


# ----------------------------------------------------------------------------
# Main
# ----------------------------------------------------------------------------

if __name__ == "__main__":
    key = jax.random.PRNGKey(0)
    kp, ko, kn, ky = jax.random.split(key, 4)

    params = make_params(kp)
    param_old = jax.random.normal(ko, (BATCH, PARAM_DIM), jnp.float32)
    param_new = jax.random.normal(kn, (BATCH, PARAM_DIM), jnp.float32)
    y = jax.random.randint(ky, (BATCH,), 0, NUM_CLASSES)

    out = jax.block_until_ready(attacker_forward(params, param_old, param_new, y))

    # Tight check against a reference that uses the same bf16 MXU operand
    # precision, plus a loose check against the pure-f32 PyTorch-semantics ref.
    ref_bf16 = reference_forward(params, param_old, param_new, y,
                                 mm_dtype=jnp.bfloat16)
    ref_f32 = reference_forward(params, param_old, param_new, y,
                                mm_dtype=jnp.float32)

    assert out.shape == (BATCH, INPUT_DIM)
    assert bool(jnp.all(jnp.isfinite(out)))
    assert bool(jnp.allclose(out, ref_bf16, rtol=2e-3, atol=2e-3)), \
        "mismatch vs bf16-matmul reference"
    assert bool(jnp.allclose(out, ref_f32, rtol=1e-1, atol=1e-1)), \
        "mismatch vs f32 reference"
    print("KERNEL_OK")
</pallas_src>

<mosaic_0001>
module attributes {stable_mosaic.version = 11 : i64} {
  func.func @_attacker_fused_kernel(%arg0: memref<128x64xf32, #tpu.memory_space<vmem>>, %arg1: memref<352x256xbf16, #tpu.memory_space<vmem>>, %arg2: memref<72x256xf32, #tpu.memory_space<vmem>>, %arg3: memref<64x256xf32, #tpu.memory_space<vmem>>) attributes {dimension_semantics = [], scalar_prefetch = 0 : i64, scratch_operands = 0 : i64, tpu.core_type = #tpu.core_type<tc>} {
    %c0 = arith.constant 0 : index
    %c0_0 = arith.constant 0 : index
    %0 = vector.load %arg2[%c0, %c0_0] : memref<72x256xf32, #tpu.memory_space<vmem>>, vector<64x32xf32>
    %c64 = arith.constant 64 : index
    %c0_1 = arith.constant 0 : index
    %1 = vector.load %arg2[%c64, %c0_1] : memref<72x256xf32, #tpu.memory_space<vmem>>, vector<1x64xf32>
    %c65 = arith.constant 65 : index
    %c0_2 = arith.constant 0 : index
    %2 = vector.load %arg2[%c65, %c0_2] : memref<72x256xf32, #tpu.memory_space<vmem>>, vector<1x32xf32>
    %c66 = arith.constant 66 : index
    %c0_3 = arith.constant 0 : index
    %3 = vector.load %arg2[%c66, %c0_3] : memref<72x256xf32, #tpu.memory_space<vmem>>, vector<1x32xf32>
    %c67 = arith.constant 67 : index
    %c0_4 = arith.constant 0 : index
    %4 = vector.load %arg2[%c67, %c0_4] : memref<72x256xf32, #tpu.memory_space<vmem>>, vector<1x32xf32>
    %c68 = arith.constant 68 : index
    %c0_5 = arith.constant 0 : index
    %5 = vector.load %arg2[%c68, %c0_5] : memref<72x256xf32, #tpu.memory_space<vmem>>, vector<1x32xf32>
    %c69 = arith.constant 69 : index
    %c0_6 = arith.constant 0 : index
    %6 = vector.load %arg2[%c69, %c0_6] : memref<72x256xf32, #tpu.memory_space<vmem>>, vector<1x128xf32>
    %c70 = arith.constant 70 : index
    %c0_7 = arith.constant 0 : index
    %7 = vector.load %arg2[%c70, %c0_7] : memref<72x256xf32, #tpu.memory_space<vmem>>, vector<1x256xf32>
    %c0_8 = arith.constant 0 : index
    %c0_9 = arith.constant 0 : index
    %8 = vector.load %arg0[%c0_8, %c0_9] : memref<128x64xf32, #tpu.memory_space<vmem>>, vector<128x64xf32>
    %9 = arith.truncf %8 : vector<128x64xf32> to vector<128x64xbf16>
    %c0_10 = arith.constant 0 : index
    %c0_11 = arith.constant 0 : index
    %10 = vector.load %arg1[%c0_10, %c0_11] : memref<352x256xbf16, #tpu.memory_space<vmem>>, vector<64x64xbf16>
    %cst = arith.constant dense<0.000000e+00> : vector<128x64xf32>
    %11 = tpu.matmul %9, %10, %cst {dimension_numbers = #tpu.dot_dimension_numbers<[1], [0], [0], [1], [0, 0, 1, 1], [], []>} : vector<128x64xbf16>, vector<64x64xbf16>, vector<128x64xf32> -> vector<128x64xf32>
    %12 = vector.broadcast %1 : vector<1x64xf32> to vector<128x64xf32>
    %13 = arith.addf %11, %12 : vector<128x64xf32>
    %cst_12 = arith.constant 0.000000e+00 : f32
    %14 = vector.broadcast %cst_12 : f32 to vector<128x64xf32>
    %15 = arith.maximumf %13, %14 : vector<128x64xf32>
    %16 = arith.truncf %15 : vector<128x64xf32> to vector<128x64xbf16>
    %c64_13 = arith.constant 64 : index
    %c0_14 = arith.constant 0 : index
    %17 = vector.load %arg1[%c64_13, %c0_14] : memref<352x256xbf16, #tpu.memory_space<vmem>>, vector<64x32xbf16>
    %cst_15 = arith.constant dense<0.000000e+00> : vector<128x32xf32>
    %18 = tpu.matmul %16, %17, %cst_15 {dimension_numbers = #tpu.dot_dimension_numbers<[1], [0], [0], [1], [0, 0, 1, 1], [], []>} : vector<128x64xbf16>, vector<64x32xbf16>, vector<128x32xf32> -> vector<128x32xf32>
    %19 = vector.broadcast %2 : vector<1x32xf32> to vector<128x32xf32>
    %20 = arith.addf %18, %19 : vector<128x32xf32>
    %cst_16 = arith.constant 0.000000e+00 : f32
    %21 = vector.broadcast %cst_16 : f32 to vector<128x32xf32>
    %22 = arith.maximumf %20, %21 : vector<128x32xf32>
    %23 = vector.extract_strided_slice %22 {offsets = [0, 0], sizes = [64, 32], strides = [1, 1]} : vector<128x32xf32> to vector<64x32xf32>
    %24 = arith.truncf %23 : vector<64x32xf32> to vector<64x32xbf16>
    %25 = vector.extract_strided_slice %22 {offsets = [64, 0], sizes = [64, 32], strides = [1, 1]} : vector<128x32xf32> to vector<64x32xf32>
    %26 = arith.truncf %25 : vector<64x32xf32> to vector<64x32xbf16>
    %c128 = arith.constant 128 : index
    %c0_17 = arith.constant 0 : index
    %27 = vector.load %arg1[%c128, %c0_17] : memref<352x256xbf16, #tpu.memory_space<vmem>>, vector<32x32xbf16>
    %cst_18 = arith.constant dense<0.000000e+00> : vector<64x32xf32>
    %28 = tpu.matmul %24, %27, %cst_18 {dimension_numbers = #tpu.dot_dimension_numbers<[1], [0], [0], [1], [0, 0, 1, 1], [], []>} : vector<64x32xbf16>, vector<32x32xbf16>, vector<64x32xf32> -> vector<64x32xf32>
    %c160 = arith.constant 160 : index
    %c0_19 = arith.constant 0 : index
    %29 = vector.load %arg1[%c160, %c0_19] : memref<352x256xbf16, #tpu.memory_space<vmem>>, vector<32x32xbf16>
    %cst_20 = arith.constant dense<0.000000e+00> : vector<64x32xf32>
    %30 = tpu.matmul %26, %29, %cst_20 {dimension_numbers = #tpu.dot_dimension_numbers<[1], [0], [0], [1], [0, 0, 1, 1], [], []>} : vector<64x32xbf16>, vector<32x32xbf16>, vector<64x32xf32> -> vector<64x32xf32>
    %31 = arith.addf %28, %30 : vector<64x32xf32>
    %32 = vector.broadcast %3 : vector<1x32xf32> to vector<64x32xf32>
    %33 = arith.addf %31, %32 : vector<64x32xf32>
    %cst_21 = arith.constant dense<0.000000e+00> : vector<32xf32>
    %34 = vector.multi_reduction <add>, %33, %cst_21 [0] : vector<64x32xf32> to vector<32xf32>
    %35 = vector.shape_cast %34 : vector<32xf32> to vector<1x32xf32>
    %cst_22 = arith.constant 1.562500e-02 : f32
    %36 = vector.broadcast %cst_22 : f32 to vector<1x32xf32>
    %37 = arith.mulf %35, %36 : vector<1x32xf32>
    %38 = arith.mulf %33, %33 : vector<64x32xf32>
    %cst_23 = arith.constant dense<0.000000e+00> : vector<32xf32>
    %39 = vector.multi_reduction <add>, %38, %cst_23 [0] : vector<64x32xf32> to vector<32xf32>
    %40 = vector.shape_cast %39 : vector<32xf32> to vector<1x32xf32>
    %cst_24 = arith.constant 1.562500e-02 : f32
    %41 = vector.broadcast %cst_24 : f32 to vector<1x32xf32>
    %42 = arith.mulf %40, %41 : vector<1x32xf32>
    %43 = arith.mulf %37, %37 : vector<1x32xf32>
    %44 = arith.subf %42, %43 : vector<1x32xf32>
    %45 = vector.broadcast %37 : vector<1x32xf32> to vector<64x32xf32>
    %46 = arith.subf %33, %45 : vector<64x32xf32>
    %cst_25 = arith.constant 9.99999974E-6 : f32
    %47 = vector.broadcast %cst_25 : f32 to vector<1x32xf32>
    %48 = arith.addf %44, %47 : vector<1x32xf32>
    %49 = math.rsqrt %48 : vector<1x32xf32>
    %50 = vector.broadcast %49 : vector<1x32xf32> to vector<64x32xf32>
    %51 = arith.mulf %46, %50 : vector<64x32xf32>
    %52 = vector.broadcast %4 : vector<1x32xf32> to vector<64x32xf32>
    %53 = arith.mulf %51, %52 : vector<64x32xf32>
    %54 = vector.broadcast %5 : vector<1x32xf32> to vector<64x32xf32>
    %55 = arith.addf %53, %54 : vector<64x32xf32>
    %cst_26 = arith.constant 0.000000e+00 : f32
    %56 = vector.broadcast %cst_26 : f32 to vector<64x32xf32>
    %57 = arith.maximumf %55, %56 : vector<64x32xf32>
    %58 = arith.addf %57, %0 : vector<64x32xf32>
    %59 = arith.truncf %58 : vector<64x32xf32> to vector<64x32xbf16>
    %c192 = arith.constant 192 : index
    %c0_27 = arith.constant 0 : index
    %60 = vector.load %arg1[%c192, %c0_27] : memref<352x256xbf16, #tpu.memory_space<vmem>>, vector<32x128xbf16>
    %cst_28 = arith.constant dense<0.000000e+00> : vector<64x128xf32>
    %61 = tpu.matmul %59, %60, %cst_28 {dimension_numbers = #tpu.dot_dimension_numbers<[1], [0], [0], [1], [0, 0, 1, 1], [], []>} : vector<64x32xbf16>, vector<32x128xbf16>, vector<64x128xf32> -> vector<64x128xf32>
    %62 = vector.broadcast %6 : vector<1x128xf32> to vector<64x128xf32>
    %63 = arith.addf %61, %62 : vector<64x128xf32>
    %cst_29 = arith.constant 0.000000e+00 : f32
    %64 = vector.broadcast %cst_29 : f32 to vector<64x128xf32>
    %65 = arith.maximumf %63, %64 : vector<64x128xf32>
    %66 = arith.truncf %65 : vector<64x128xf32> to vector<64x128xbf16>
    %c224 = arith.constant 224 : index
    %c0_30 = arith.constant 0 : index
    %67 = vector.load %arg1[%c224, %c0_30] : memref<352x256xbf16, #tpu.memory_space<vmem>>, vector<128x256xbf16>
    %cst_31 = arith.constant dense<0.000000e+00> : vector<64x256xf32>
    %68 = tpu.matmul %66, %67, %cst_31 {dimension_numbers = #tpu.dot_dimension_numbers<[1], [0], [0], [1], [0, 0, 1, 1], [], []>} : vector<64x128xbf16>, vector<128x256xbf16>, vector<64x256xf32> -> vector<64x256xf32>
    %69 = vector.broadcast %7 : vector<1x256xf32> to vector<64x256xf32>
    %70 = arith.addf %68, %69 : vector<64x256xf32>
    %c0_32 = arith.constant 0 : index
    %c0_33 = arith.constant 0 : index
    %71 = vector.load %arg3[%c0_32, %c0_33] : memref<64x256xf32, #tpu.memory_space<vmem>>, vector<64x256xf32>
    tpu.vector_store %arg3[%c0_32, %c0_33], %70 {strides = array<i32>} : memref<64x256xf32, #tpu.memory_space<vmem>>, vector<64x256xf32>,
    return
  }
}

</mosaic_0001>

<bundles_post_ra>
// kernel: attacker_forward.1
= control target key start
LH: loop header
LB: loop body
LE: loop exit
PB: predicated region body
PF: predicated region fallthrough
CT: control target
= control target key end

     0   :  { %vm88_vm0 = vcmask 523264   ;;  %s1599_s0 = inlined_call_operand.vmem [shape: f32[128,64], index: 0, kind: input, shape index: {}]   ;;  %s1600_s1 = inlined_call_operand.vmem [shape: bf16[352,256], index: 1, kind: input, shape index: {}]   ;;  %s1601_s2 = inlined_call_operand.vmem [shape: f32[72,256], index: 2, kind: input, shape index: {}]   ;;  %s1602_s3 = inlined_call_operand.hbm [shape: f32[64,256], index: 3, kind: output, shape index: {}]  }
   0x1   :  { %v1236_v0 = vld [vmem:[%s1600_s1] ss:$8 sps:$4 sm:$0xff]   ;;  %v1237_v1 = vld [vmem:[%s1600_s1 + $0x10] ss:$8 sps:$4 sm:$0xff]  }
   0x2   :  { %1132 = vmatprep.subr.bf16.mxu0 %v1236_v0  ;;  %v1238_v2 = vld [vmem:[%s1600_s1 + $0x20] ss:$8 sps:$4 sm:$0xff]   ;;  %v1239_v6 = vld [vmem:[%s1600_s1 + $0x30] ss:$8 sps:$4 sm:$0xff]  }
   0x3   :  { %1133 = vmatpush3.bf16.msra.mxu0 %v1236_v0  ;;  %v32_v3 = vld [vmem:[%s1599_s0] sm:$0xff]  ;;  %v33_v4 = vld [vmem:[%s1599_s0 + $0x8] sm:$0xff]  ;;  %v34_v7 = vld [vmem:[%s1599_s0 + $0x10] sm:$0xff] }
   0x4   :  { %1134 = vmatprep.subr.bf16.mxu0 %v1237_v1  ;;  %v48_v5 = vpack.c.bf16 %v33_v4, %v32_v3  ;;  %v35_v8 = vld [vmem:[%s1599_s0 + $0x18] sm:$0xff]  ;;  %v36_v9 = vld [vmem:[%s1599_s0 + $0x20] sm:$0xff]  ;;  %v37_v10 = vld [vmem:[%s1599_s0 + $0x28] sm:$0xff] }
   0x5   :  { %v1240_v11 = vld [vmem:[%s1600_s1 + $0x40] ss:$8 sps:$4 sm:$0xff]   ;;  %v1241_v12 = vld [vmem:[%s1600_s1 + $0x50] ss:$8 sps:$4 sm:$0xff]   ;;  %v49_v13 = vpack.c.bf16 %v35_v8, %v34_v7  ;;  %v50_v14 = vpack.c.bf16 %v37_v10, %v36_v9 }
   0x6   :  { %1140 = vmatprep.mubr.msk.bf16.mxu0 %vm88_vm0, %v48_v5  ;;  %1216 = vmatprep.subr.bf16.mxu1 %v1240_v11  ;;  %v38_v15 = vld [vmem:[%s1599_s0 + $0x30] sm:$0xff]  ;;  %v39_v16 = vld [vmem:[%s1599_s0 + $0x38] sm:$0xff]  ;;  %v40_v17 = vld [vmem:[%s1599_s0 + $0x40] sm:$0xff] }
   0x7   :  { %1135 = vmatpush3.bf16.msra.mxu0 %v1237_v1  ;;  %1220 = vmatpush3.bf16.msra.mxu1 %v1240_v11  ;;  %v41_v18 = vld [vmem:[%s1599_s0 + $0x48] sm:$0xff]  ;;  %v51_v19 = vpack.c.bf16 %v39_v16, %v38_v15 }
   0x8   :  { %1136 = vmatprep.subr.bf16.mxu0 %v1238_v2  ;;  %1217 = vmatprep.subr.bf16.mxu1 %v1241_v12 }
   0xb   :  { %1137 = vmatpush3.bf16.msra.mxu0 %v1238_v2  ;;  %1221 = vmatpush3.bf16.msra.mxu1 %v1241_v12 }
   0xc   :  { %1138 = vmatprep.subr.bf16.mxu0 %v1239_v6 }
   0xf   :  { %1139 = vmatpush3.bf16.msra.mxu0 %v1239_v6 }
  0x10   :  { %1156 = vmatprep.subr.bf16.mxu0 %v1240_v11 }
  0x12   :  { %1141 = vmatmul.mubr.msk.bf16.vlgmr.msra.gmra.mrb[0].mxu0 %vm88_vm0, %v49_v13 }
  0x13   :  { %1144 = vmatprep.mubr.msk.bf16.mxu0 %vm88_vm0, %v50_v14  ;;  %1157 = vmatpush3.bf16.msra.mxu0 %v1240_v11 }
  0x14   :  { %1158 = vmatprep.subr.bf16.mxu0 %v1241_v12 }
  0x15   :  { %8 = vsyncpa [#allocation3], 0  ;;  %v52_v20 = vpack.c.bf16 %v41_v18, %v40_v17  ;;  %v42_v21 = vld [vmem:[%s1599_s0 + $0x50] sm:$0xff]  ;;  %v43_v22 = vld [vmem:[%s1599_s0 + $0x58] sm:$0xff]  ;;  %vm431_vm1 = vcmask 261120  }
  0x16   :  { %v44_v23 = vld [vmem:[%s1599_s0 + $0x60] sm:$0xff]  ;;  %v45_v24 = vld [vmem:[%s1599_s0 + $0x68] sm:$0xff]  ;;  %v53_v25 = vpack.c.bf16 %v43_v22, %v42_v21  ;;  %v46_v27 = vld [vmem:[%s1599_s0 + $0x70] sm:$0xff] }
  0x17   :  { %1159 = vmatpush3.bf16.msra.mxu0 %v1241_v12  ;;  %v54_v26 = vpack.c.bf16 %v45_v24, %v44_v23  ;;  %v47_v28 = vld [vmem:[%s1599_s0 + $0x78] sm:$0xff]  ;;  %v1242_v30 = vld [vmem:[%s1600_s1 + $0x60] ss:$8 sps:$4 sm:$0xff]  }
  0x18   :  { %v55_v29 = vpack.c.bf16 %v47_v28, %v46_v27  ;;  %1160 = vmatprep.subr.bf16.mxu0 %v1242_v30  ;;  %1218 = vmatprep.subr.bf16.mxu1 %v1242_v30  ;;  %v1243_v31 = vld [vmem:[%s1600_s1 + $0x70] ss:$8 sps:$4 sm:$0xff]   ;;  %v24_v32 = vld [vmem:[%s1601_s2 + $0x80] ss:$0 sm:$0xff]  ;;  %v25_v28 = vld [vmem:[%s1601_s2 + $0x81] ss:$0 sm:$0xff] }
  0x19   :  { %1222 = vmatpush3.bf16.msra.mxu1 %v1242_v30  ;;  %v1246_v27 = vld [vmem:[%s1600_s1 + $0x80] ss:$8 sps:$4 sm:$0xff]  }
  0x1a   :  { %1145 = vmatmul.mubr.msk.bf16.gmra.mrb[4].mxu0 %vm88_vm0, %v51_v19  ;;  %1219 = vmatprep.subr.bf16.mxu1 %v1243_v31 }
  0x1b   :  { %1148 = vmatprep.mubr.msk.bf16.mxu0 %vm88_vm0, %v52_v20  ;;  %1161 = vmatpush3.bf16.msra.mxu0 %v1242_v30 }
  0x1c   :  { %1162 = vmatprep.subr.bf16.mxu0 %v1243_v31 }
  0x1d   :  { %1223 = vmatpush3.bf16.msra.mxu1 %v1243_v31 }
  0x1f   :  { %1163 = vmatpush3.bf16.msra.mxu0 %v1243_v31 }
  0x22   :  { %1149 = vmatmul.mubr.msk.bf16.gmra.mrb[8].mxu0 %vm88_vm0, %v53_v25  ;;  %v1244_v25 = vld [vmem:[%s1600_s1 + $0xa0] ss:$8 sps:$4 sm:$0xff]  }
  0x23   :  { %1152 = vmatprep.mubr.msk.bf16.mxu0 %vm88_vm0, %v54_v26  ;;  %1180 = vmatprep.subr.bf16.mxu0 %v1244_v25  ;;  %v1245_v26 = vld [vmem:[%s1600_s1 + $0xb0] ss:$8 sps:$4 sm:$0xff]  }
  0x2a   :  { %1153 = vmatmul.mubr.msk.bf16.gmra.mrb[12].mxu0 %vm88_vm0, %v55_v29 }
  0xe5   :  { %v1142_v33 = vpop.f32.mrb[0].mxu0 }
  0xe6   :  { %v156_v34 = vadd.f32 %v1142_v33, %v24_v32  ;;  %v147_v35 = vpop.f32.mrb[1].mxu0 }
  0xe7   :  { %v148_v36 = vadd.f32 %v147_v35, %v24_v32  ;;  %v1143_v37 = vpop.f32.mrb[2].mxu0 }
  0xe8   :  { %v159_v38 = vadd.f32 %v1143_v37, %v24_v32  ;;  %v150_v39 = vpop.f32.mrb[3].mxu0  ;;  %v212_v41 = vmax.f32 %v156_v34, 0.0 }
  0xe9   :  { %v151_v40 = vadd.f32 %v150_v39, %v24_v32  ;;  %v210_v43 = vmax.f32 %v148_v36, 0.0 }
  0xea   :  { %v213_v42 = vmax.f32 %v159_v38, 0.0 }
  0xeb   :  { %v211_v44 = vmax.f32 %v151_v40, 0.0 }
  0xec   :  { %v227_v45 = vpack.c.bf16 %v213_v42, %v212_v41 }
  0xed   :  { %v226_v46 = vpack.c.bf16 %v211_v44, %v210_v43  ;;  %v1146_v47 = vpop.f32.mrb[4].mxu0 }
  0xee   :  { %v172_v48 = vadd.f32 %v1146_v47, %v24_v32  ;;  %v163_v49 = vpop.f32.mrb[5].mxu0 }
  0xef   :  { %v164_v50 = vadd.f32 %v163_v49, %v24_v32  ;;  %v1147_v51 = vpop.f32.mrb[6].mxu0  ;;  %1164 = vmatprep.mubr.msk.bf16.mxu0 %vm88_vm0, %v226_v46 }
  0xf0   :  { %v175_v52 = vadd.f32 %v1147_v51, %v24_v32  ;;  %v166_v53 = vpop.f32.mrb[7].mxu0  ;;  %1165 = vmatmul.mubr.msk.bf16.vlgmr.msra.gmra.mrb[16].mxu0 %vm88_vm0, %v227_v45  ;;  %v216_v55 = vmax.f32 %v172_v48, 0.0 }
  0xf1   :  { %v167_v54 = vadd.f32 %v166_v53, %v24_v32  ;;  %v214_v57 = vmax.f32 %v164_v50, 0.0  ;;  %1181 = vmatpush3.bf16.msra.mxu0 %v1244_v25  ;;  %v26_v25 = vld [vmem:[%s1601_s2 + $0x82] ss:$0 sm:$0xff] }
  0xf2   :  { %v217_v56 = vmax.f32 %v175_v52, 0.0  ;;  %1182 = vmatprep.subr.bf16.mxu0 %v1245_v26 }
  0xf3   :  { %v215_v58 = vmax.f32 %v167_v54, 0.0 }
  0xf4   :  { %v229_v59 = vpack.c.bf16 %v217_v56, %v216_v55 }
  0xf5   :  { %v228_v60 = vpack.c.bf16 %v215_v58, %v214_v57  ;;  %v1150_v61 = vpop.f32.mrb[8].mxu0  ;;  %1183 = vmatpush3.bf16.msra.mxu0 %v1245_v26 }
  0xf6   :  { %v188_v62 = vadd.f32 %v1150_v61, %v24_v32  ;;  %v179_v63 = vpop.f32.mrb[9].mxu0  ;;  %1192 = vmatprep.subr.bf16.mxu0 %v1246_v27 }
  0xf7   :  { %v180_v0 = vadd.f32 %v179_v63, %v24_v32  ;;  %v1151_v1 = vpop.f32.mrb[10].mxu0  ;;  %1168 = vmatprep.mubr.msk.bf16.mxu0 %vm88_vm0, %v228_v60 }
  0xf8   :  { %v191_v2 = vadd.f32 %v1151_v1, %v24_v32  ;;  %v182_v3 = vpop.f32.mrb[11].mxu0  ;;  %1169 = vmatmul.mubr.msk.bf16.gmra.mrb[20].mxu0 %vm88_vm0, %v229_v59  ;;  %v220_v5 = vmax.f32 %v188_v62, 0.0 }
  0xf9   :  { %v183_v4 = vadd.f32 %v182_v3, %v24_v32  ;;  %v218_v7 = vmax.f32 %v180_v0, 0.0 }
  0xfa   :  { %v221_v6 = vmax.f32 %v191_v2, 0.0 }
  0xfb   :  { %v219_v8 = vmax.f32 %v183_v4, 0.0 }
  0xfc   :  { %v231_v9 = vpack.c.bf16 %v221_v6, %v220_v5 }
  0xfd   :  { %v1154_v10 = vpop.f32.mrb[12].mxu0  ;;  %v230_v11 = vpack.c.bf16 %v219_v8, %v218_v7 }
  0xfe   :  { %v204_v12 = vadd.f32 %v1154_v10, %v24_v32  ;;  %v195_v13 = vpop.f32.mrb[13].mxu0  ;;  %v1247_v10 = vld [vmem:[%s1600_s1 + $0x90] ss:$8 sps:$4 sm:$0xff]  }
  0xff   :  { %v196_v14 = vadd.f32 %v195_v13, %v24_v32  ;;  %v1155_v15 = vpop.f32.mrb[14].mxu0  ;;  %1172 = vmatprep.mubr.msk.bf16.mxu1 %vm88_vm0, %v230_v11 }
 0x100   :  { %v207_v16 = vadd.f32 %v1155_v15, %v24_v32  ;;  %v198_v17 = vpop.f32.mrb[15].mxu0  ;;  %1173 = vmatmul.mubr.msk.bf16.vlgmr.msra.gmra.mrb[0].mxu1 %vm88_vm0, %v231_v9  ;;  %v224_v19 = vmax.f32 %v204_v12, 0.0 }
 0x101   :  { %v199_v18 = vadd.f32 %v198_v17, %v24_v32  ;;  %v222_v21 = vmax.f32 %v196_v14, 0.0 }
 0x102   :  { %v225_v20 = vmax.f32 %v207_v16, 0.0 }
 0x103   :  { %v223_v22 = vmax.f32 %v199_v18, 0.0 }
 0x104   :  { %v233_v23 = vpack.c.bf16 %v225_v20, %v224_v19 }
 0x105   :  { %v232_v24 = vpack.c.bf16 %v223_v22, %v222_v21  ;;  %v1248_v22 = vld [vmem:[%s1600_s1 + $0xc0] ss:$8 sps:$4 sm:$0xff]  }
 0x106   :  { %1204 = vmatprep.subr.bf16.mxu1 %v1248_v22 }
 0x107   :  { %1176 = vmatprep.mubr.msk.bf16.mxu1 %vm88_vm0, %v232_v24  ;;  %1205 = vmatpush3.bf16.msra.mxu1 %v1248_v22  ;;  %v1252_v24 = vld [vmem:[%s1600_s1 + $0xe4] ss:$8 sps:$4 sm:$0xff]  }
 0x108   :  { %1177 = vmatmul.mubr.msk.bf16.gmra.mrb[4].mxu1 %vm88_vm0, %v233_v23  ;;  %v1249_v23 = vld [vmem:[%s1600_s1 + $0xd0] ss:$8 sps:$4 sm:$0xff]  }
 0x109   :  { %1206 = vmatprep.subr.bf16.mxu1 %v1249_v23 }
 0x10b   :  { %1207 = vmatpush3.bf16.msra.mxu1 %v1249_v23 }
 0x10c   :  { %926 = vmatprep.subr.bf16.mxu1 %v1252_v24 }
 0x1c3   :  { %v1166_v29 = vpop.f32.mrb[16].mxu0 }
 0x1c4   :  { %v333_v30 = vadd.f32 %v1166_v29, %v25_v28  ;;  %v324_v31 = vpop.f32.mrb[17].mxu0 }
 0x1c5   :  { %v325_v32 = vadd.f32 %v324_v31, %v25_v28  ;;  %v1167_v33 = vpop.f32.mrb[18].mxu0 }
 0x1c6   :  { %v336_v34 = vadd.f32 %v1167_v33, %v25_v28  ;;  %v327_v35 = vpop.f32.mrb[19].mxu0  ;;  %v389_v37 = vmax.f32 %v333_v30, 0.0 }
 0x1c7   :  { %v328_v36 = vadd.f32 %v327_v35, %v25_v28  ;;  %v387_v39 = vmax.f32 %v325_v32, 0.0 }
 0x1c8   :  { %v390_v38 = vmax.f32 %v336_v34, 0.0 }
 0x1c9   :  { %v388_v40 = vmax.f32 %v328_v36, 0.0 }
 0x1ca   :  { %v404_v41 = vpack.c.bf16 %v390_v38, %v389_v37 }
 0x1cb   :  { %v403_v42 = vpack.c.bf16 %v388_v40, %v387_v39  ;;  %v1170_v43 = vpop.f32.mrb[20].mxu0 }
 0x1cc   :  { %v349_v44 = vadd.f32 %v1170_v43, %v25_v28  ;;  %v340_v45 = vpop.f32.mrb[21].mxu0 }
 0x1cd   :  { %v341_v46 = vadd.f32 %v340_v45, %v25_v28  ;;  %v1171_v47 = vpop.f32.mrb[22].mxu0 }
 0x1ce   :  { %v352_v48 = vadd.f32 %v1171_v47, %v25_v28  ;;  %v343_v49 = vpop.f32.mrb[23].mxu0  ;;  %v393_v51 = vmax.f32 %v349_v44, 0.0 }
 0x1cf   :  { %v344_v50 = vadd.f32 %v343_v49, %v25_v28  ;;  %v391_v53 = vmax.f32 %v341_v46, 0.0 }
 0x1d0   :  { %v394_v52 = vmax.f32 %v352_v48, 0.0 }
 0x1d1   :  { %v392_v54 = vmax.f32 %v344_v50, 0.0 }
 0x1d2   :  { %v406_v55 = vpack.c.bf16 %v394_v52, %v393_v51 }
 0x1d3   :  { %v405_v56 = vpack.c.bf16 %v392_v54, %v391_v53  ;;  %v1174_v57 = vpop.f32.mrb[0].mxu1 }
 0x1d4   :  { %v365_v58 = vadd.f32 %v1174_v57, %v25_v28  ;;  %v356_v59 = vpop.f32.mrb[1].mxu1 }
 0x1d5   :  { %v357_v60 = vadd.f32 %v356_v59, %v25_v28  ;;  %v1175_v61 = vpop.f32.mrb[2].mxu1 }
 0x1d6   :  { %v368_v62 = vadd.f32 %v1175_v61, %v25_v28  ;;  %v359_v63 = vpop.f32.mrb[3].mxu1  ;;  %v397_v1 = vmax.f32 %v365_v58, 0.0 }
 0x1d7   :  { %v360_v0 = vadd.f32 %v359_v63, %v25_v28  ;;  %v395_v3 = vmax.f32 %v357_v60, 0.0 }
 0x1d8   :  { %v398_v2 = vmax.f32 %v368_v62, 0.0 }
 0x1d9   :  { %v396_v4 = vmax.f32 %v360_v0, 0.0 }
 0x1da   :  { %v408_v5 = vpack.c.bf16 %v398_v2, %v397_v1 }
 0x1db   :  { %v407_v6 = vpack.c.bf16 %v396_v4, %v395_v3  ;;  %v1178_v7 = vpop.f32.mrb[4].mxu1 }
 0x1dc   :  { %v381_v8 = vadd.f32 %v1178_v7, %v25_v28  ;;  %v372_v9 = vpop.f32.mrb[5].mxu1 }
 0x1dd   :  { %v373_v11 = vadd.f32 %v372_v9, %v25_v28  ;;  %v1179_v12 = vpop.f32.mrb[6].mxu1  ;;  %1184 = vmatprep.mubr.msk.bf16.mxu0 %vm431_vm1, %v407_v6 }
 0x1de   :  { %v384_v13 = vadd.f32 %v1179_v12, %v25_v28  ;;  %v375_v14 = vpop.f32.mrb[7].mxu1  ;;  %1185 = vmatmul.mubr.msk.bf16.vlgmr.msra.gmra.mrb[24].mxu0 %vm431_vm1, %v408_v5  ;;  %v401_v16 = vmax.f32 %v381_v8, 0.0 }
 0x1df   :  { %v376_v15 = vadd.f32 %v375_v14, %v25_v28  ;;  %1193 = vmatpush3.bf16.msra.mxu0 %v1246_v27  ;;  %v399_v18 = vmax.f32 %v373_v11, 0.0 }
 0x1e0   :  { %v402_v17 = vmax.f32 %v384_v13, 0.0  ;;  %1194 = vmatprep.subr.bf16.mxu0 %v1247_v10 }
 0x1e1   :  { %v400_v19 = vmax.f32 %v376_v15, 0.0 }
 0x1e2   :  { %v410_v20 = vpack.c.bf16 %v402_v17, %v401_v16 }
 0x1e3   :  { %v409_v21 = vpack.c.bf16 %v400_v19, %v399_v18  ;;  %1195 = vmatpush3.bf16.msra.mxu0 %v1247_v10 }
 0x1e5   :  { %1188 = vmatprep.mubr.msk.bf16.mxu0 %vm431_vm1, %v409_v21 }
 0x1e6   :  { %1189 = vmatmul.mubr.msk.bf16.gmra.mrb[28].mxu0 %vm431_vm1, %v410_v20 }
 0x1e7   :  { %1196 = vmatprep.mubr.msk.bf16.mxu0 %vm431_vm1, %v403_v42 }
 0x1ee   :  { %1197 = vmatmul.mubr.msk.bf16.vlgmr.msra.gmra.mrb[24].mxu0 %vm431_vm1, %v404_v41 }
 0x1ef   :  { %1200 = vmatprep.mubr.msk.bf16.mxu0 %vm431_vm1, %v405_v56 }
 0x1f6   :  { %1201 = vmatmul.mubr.msk.bf16.gmra.mrb[28].mxu0 %vm431_vm1, %v406_v55 }
 0x2c1   :  { %v1198_v26 = vpop.f32.mrb[24].mxu0 }
 0x2c2   :  { %v567_v27 = vpop.f32.mrb[25].mxu0  ;;  %v1450_v28 = vadd.f32 %v1198_v26, %v26_v25 }
 0x2c3   :  { %v1452_v29 = vadd.f32 %v567_v27, %v26_v25  ;;  %v1199_v30 = vpop.f32.mrb[26].mxu0 }
 0x2c4   :  { %v570_v31 = vpop.f32.mrb[27].mxu0  ;;  %v1456_v33 = vadd.f32 %v1199_v30, %v26_v25  ;;  %v630_v35 = vmul.f32 %v1450_v28, %v1450_v28  ;;  %v609_v40 = vsel %vm431_vm1, %v1450_v28, 0.0 }
 0x2c5   :  { %v628_v32 = vmul.f32 %v1452_v29, %v1452_v29  ;;  %v1458_v34 = vadd.f32 %v570_v31, %v26_v25  ;;  %v606_v36 = vsel %vm431_vm1, %v1452_v29, 0.0 }
 0x2c6   :  { %v631_v42 = vmul.f32 %v1456_v33, %v1456_v33  ;;  %v639_v48 = vsel %vm431_vm1, %v630_v35, 0.0  ;;  %v611_v49 = vsel %vm431_vm1, %v1456_v33, 0.0 }
 0x2c7   :  { %v607_v37 = vsel %vm431_vm1, %v1458_v34, 0.0  ;;  %v629_v38 = vmul.f32 %v1458_v34, %v1458_v34  ;;  %v636_v41 = vsel %vm431_vm1, %v628_v32, 0.0 }
 0x2c8   :  { %v608_v39 = vadd.f32 %v607_v37, %v606_v36  ;;  %v641_v56 = vsel %vm431_vm1, %v631_v42, 0.0 }
 0x2c9   :  { %v637_v43 = vsel %vm431_vm1, %v629_v38, 0.0  ;;  %v1202_v44 = vpop.f32.mrb[28].mxu0 }
 0x2ca   :  { %v610_v45 = vadd.f32 %v609_v40, %v608_v39  ;;  %v638_v46 = vadd.f32 %v637_v43, %v636_v41  ;;  %v583_v47 = vpop.f32.mrb[29].mxu0  ;;  %v1479_v53 = vadd.f32 %v1202_v44, %v26_v25 }
 0x2cb   :  { %v1477_v50 = vadd.f32 %v583_v47, %v26_v25  ;;  %v1203_v51 = vpop.f32.mrb[30].mxu0 }
 0x2cc   :  { %v640_v52 = vadd.f32 %v639_v48, %v638_v46  ;;  %v612_v54 = vadd.f32 %v611_v49, %v610_v45  ;;  %v586_v55 = vpop.f32.mrb[31].mxu0  ;;  %v605_v62 = vadd.f32 %v1203_v51, %v26_v25  ;;  %v634_v1 = vmul.f32 %v1479_v53, %v1479_v53 }
 0x2cd   :  { %v613_v57 = vsel %vm431_vm1, %v1477_v50, 0.0  ;;  %v632_v58 = vmul.f32 %v1477_v50, %v1477_v50  ;;  %v603_v59 = vadd.f32 %v586_v55, %v26_v25  ;;  %v617_v5 = vsel %vm431_vm1, %v1479_v53, 0.0 }
 0x2ce   :  { %v614_v60 = vadd.f32 %v613_v57, %v612_v54  ;;  %v642_v61 = vadd.f32 %v641_v56, %v640_v52  ;;  %v635_v6 = vmul.f32 %v605_v62, %v605_v62  ;;  %v619_v9 = vsel %vm431_vm1, %v605_v62, 0.0 }
 0x2cf   :  { %v643_v63 = vsel %vm431_vm1, %v632_v58, 0.0  ;;  %v615_v0 = vsel %vm431_vm1, %v603_v59, 0.0  ;;  %v633_v4 = vmul.f32 %v603_v59, %v603_v59  ;;  %v647_v11 = vsel %vm431_vm1, %v634_v1, 0.0  ;;  %v18_v1 = vld [vmem:[%s1601_s2 + $0x20] sm:$0xff] }
 0x2d0   :  { %v644_v2 = vadd.f32 %v643_v63, %v642_v61  ;;  %v616_v3 = vadd.f32 %v615_v0, %v614_v60  ;;  %v649_v14 = vsel %vm431_vm1, %v635_v6, 0.0  ;;  %v16_v61 = vld [vmem:[%s1601_s2] sm:$0xff]  ;;  %v21_v6 = vld [vmem:[%s1601_s2 + $0x50] sm:$0xff] }
 0x2d1   :  { %v645_v8 = vsel %vm431_vm1, %v633_v4, 0.0 }
 0x2d2   :  { %v618_v7 = vadd.f32 %v617_v5, %v616_v3  ;;  %v646_v10 = vadd.f32 %v645_v8, %v644_v2  ;;  %v19_v3 = vld [vmem:[%s1601_s2 + $0x30] sm:$0xff]  ;;  %v20_v5 = vld [vmem:[%s1601_s2 + $0x40] sm:$0xff] }
 0x2d4   :  { %v620_v12 = vadd.f32 %v619_v9, %v618_v7  ;;  %v648_v13 = vadd.f32 %v647_v11, %v646_v10 }
 0x2d6   :  { %v621_v15 = vrot.slane %v620_v12, 4  ;;  %v650_v16 = vadd.f32 %v649_v14, %v648_v13  ;;  %v22_v14 = vld [vmem:[%s1601_s2 + $0x60] sm:$0xff] }
 0x2d8   :  { %v622_v17 = vadd.f32 %v621_v15, %v620_v12  ;;  %v651_v18 = vrot.slane %v650_v16, 4  ;;  %v23_v15 = vld [vmem:[%s1601_s2 + $0x70] sm:$0xff] }
 0x2da   :  { %v623_v19 = vrot.slane %v622_v17, 2  ;;  %v652_v20 = vadd.f32 %v651_v18, %v650_v16 }
 0x2dc   :  { %v624_v21 = vadd.f32 %v623_v19, %v622_v17  ;;  %v653_v22 = vrot.slane %v652_v20, 2 }
 0x2de   :  { %v625_v23 = vrot.slane %v624_v21, 1  ;;  %v654_v24 = vadd.f32 %v653_v22, %v652_v20 }
 0x2e0   :  { %v626_v25 = vadd.f32 %v625_v23, %v624_v21  ;;  %v655_v26 = vrot.slane %v654_v24, 1 }
 0x2e2   :  { %v627_v27 = vmul.f32 0.015625, %v626_v25  ;;  %v656_v30 = vadd.f32 %v655_v26, %v654_v24 }
 0x2e4   :  { %v658_v31 = vmul.f32 %v627_v27, %v627_v27  ;;  %v665_v32 = vsub.f32 %v603_v59, %v627_v27  ;;  %v660_v35 = vsub.f32 %v1452_v29, %v627_v27  ;;  %v661_v36 = vsub.f32 %v1458_v34, %v627_v27  ;;  %v27_v29 = vld [vmem:[%s1601_s2 + $0x83] ss:$0 sm:$0xff] }
 0x2e5   :  { %v657_v37 = vmul.f32 0.015625, %v656_v30  ;;  %v662_v38 = vsub.f32 %v1450_v28, %v627_v27  ;;  %v663_v39 = vsub.f32 %v1456_v33, %v627_v27  ;;  %v664_v40 = vsub.f32 %v1477_v50, %v627_v27  ;;  %v28_v28 = vld [vmem:[%s1601_s2 + $0x84] ss:$0 sm:$0xff] }
 0x2e6   :  { %v666_v41 = vsub.f32 %v1479_v53, %v627_v27  ;;  %v667_v42 = vsub.f32 %v605_v62, %v627_v27  ;;  %v17_v62 = vld [vmem:[%s1601_s2 + $0x10] sm:$0xff] }
 0x2e7   :  { %v659_v43 = vsub.f32 %v657_v37, %v658_v31  ;;  %v1250_v31 = vld [vmem:[%s1600_s1 + $0xe0] ss:$8 sps:$4 sm:$0xff]   ;;  %v1255_v37 = vld [vmem:[%s1600_s1 + $0xf4] ss:$8 sps:$4 sm:$0xff]  }
 0x2e9   :  { %v668_v44 = vadd.f32 1e-05, %v659_v43  ;;  %v1264_v43 = vld [vmem:[%s1600_s1 + $0x124] ss:$8 sps:$4 sm:$0xff]  }
 0x2eb   :  { %1274 = vrsqrt.f32 %v668_v44  ;;  %v1262_v44 = vld [vmem:[%s1600_s1 + $0x120] ss:$8 sps:$4 sm:$0xff]  }
 0x2f5   :  { %v1275_v45 = vpop.eup %1274 }
 0x2f6   :  { %v675_v46 = vmul.f32 %v1275_v45, %v665_v32  ;;  %v670_v34 = vmul.f32 %v1275_v45, %v660_v35  ;;  %v671_v47 = vmul.f32 %v1275_v45, %v661_v36  ;;  %v672_v48 = vmul.f32 %v1275_v45, %v662_v38  ;;  %v1253_v38 = vld [vmem:[%s1600_s1 + $0xf0] ss:$8 sps:$4 sm:$0xff]  }
 0x2f7   :  { %v673_v33 = vmul.f32 %v1275_v45, %v663_v39  ;;  %v674_v49 = vmul.f32 %v1275_v45, %v664_v40  ;;  %v676_v50 = vmul.f32 %v1275_v45, %v666_v41  ;;  %v677_v51 = vmul.f32 %v1275_v45, %v667_v42  ;;  %v1258_v39 = vld [vmem:[%s1600_s1 + $0x104] ss:$8 sps:$4 sm:$0xff]   ;;  %v1256_v40 = vld [vmem:[%s1600_s1 + $0x100] ss:$8 sps:$4 sm:$0xff]   ;;  %v1261_v41 = vld [vmem:[%s1600_s1 + $0x114] ss:$8 sps:$4 sm:$0xff]  }
 0x2f8   :  { %v683_v52 = vmul.f32 %v675_v46, %v27_v29  ;;  %v678_v53 = vmul.f32 %v670_v34, %v27_v29  ;;  %v679_v54 = vmul.f32 %v671_v47, %v27_v29  ;;  %v680_v55 = vmul.f32 %v672_v48, %v27_v29  ;;  %v1259_v42 = vld [vmem:[%s1600_s1 + $0x110] ss:$8 sps:$4 sm:$0xff]   ;;  %v1267_v45 = vld [vmem:[%s1600_s1 + $0x134] ss:$8 sps:$4 sm:$0xff]   ;;  %v1270_v46 = vld [vmem:[%s1600_s1 + $0x144] ss:$8 sps:$4 sm:$0xff]  }
 0x2f9   :  { %v681_v56 = vmul.f32 %v673_v33, %v27_v29  ;;  %v682_v57 = vmul.f32 %v674_v49, %v27_v29  ;;  %v684_v58 = vmul.f32 %v676_v50, %v27_v29  ;;  %v685_v59 = vmul.f32 %v677_v51, %v27_v29  ;;  %v1265_v29 = vld [vmem:[%s1600_s1 + $0x130] ss:$8 sps:$4 sm:$0xff]   ;;  %v1268_v34 = vld [vmem:[%s1600_s1 + $0x140] ss:$8 sps:$4 sm:$0xff]   ;;  %v1273_v47 = vld [vmem:[%s1600_s1 + $0x154] ss:$8 sps:$4 sm:$0xff]  }
 0x2fa   :  { %v691_v60 = vadd.f32 %v683_v52, %v28_v28  ;;  %v686_v63 = vadd.f32 %v678_v53, %v28_v28  ;;  %v687_v0 = vadd.f32 %v679_v54, %v28_v28  ;;  %v688_v2 = vadd.f32 %v680_v55, %v28_v28  ;;  %v1271_v48 = vld [vmem:[%s1600_s1 + $0x150] ss:$8 sps:$4 sm:$0xff]   ;;  %v29_v33 = vld [vmem:[%s1601_s2 + $0x85] ss:$0 sm:$0xff] }
 0x2fb   :  { %v689_v4 = vadd.f32 %v681_v56, %v28_v28  ;;  %v690_v7 = vadd.f32 %v682_v57, %v28_v28  ;;  %v692_v8 = vadd.f32 %v684_v58, %v28_v28  ;;  %v693_v9 = vadd.f32 %v685_v59, %v28_v28 }
 0x2fc   :  { %v694_v10 = vmax.f32 %v686_v63, 0.0  ;;  %v695_v11 = vmax.f32 %v687_v0, 0.0  ;;  %v696_v12 = vmax.f32 %v688_v2, 0.0  ;;  %v699_v13 = vmax.f32 %v691_v60, 0.0 }
 0x2fd   :  { %v697_v16 = vmax.f32 %v689_v4, 0.0  ;;  %v698_v17 = vmax.f32 %v690_v7, 0.0  ;;  %v700_v18 = vmax.f32 %v692_v8, 0.0  ;;  %v701_v19 = vmax.f32 %v693_v9, 0.0 }
 0x2fe   :  { %v702_v20 = vadd.f32 %v694_v10, %v16_v61  ;;  %v703_v21 = vadd.f32 %v695_v11, %v17_v62  ;;  %v704_v22 = vadd.f32 %v696_v12, %v18_v1  ;;  %v707_v23 = vadd.f32 %v699_v13, %v21_v6 }
 0x2ff   :  { %v705_v24 = vadd.f32 %v697_v16, %v19_v3  ;;  %v706_v25 = vadd.f32 %v698_v17, %v20_v5  ;;  %v708_v26 = vadd.f32 %v700_v18, %v22_v14  ;;  %v709_v27 = vadd.f32 %v701_v19, %v23_v15  ;;  %v1031_v16 = vld [vmem:[%s1601_s2 + $0x86] ss:$8 sm:$0x3]  ;;  %s1301_s2 = smov [#allocation2]  }
 0x300   :  { %v710_v30 = vpack.c.bf16 %v703_v21, %v702_v20  ;;  %v1300_v28 = vmov 0   ;;  %v836_v13 = vlaneseq  ;;  %s1020_s22 = sshll.u32 %s1301_s2, 4  ;;  %s1021_s22 = int_to_ptr.vmem [resolvable:$true] %s1020_s22 }
 0x301   :  { %v711_v32 = vpack.c.bf16 %v705_v24, %v704_v22  ;;  %v712_v35 = vpack.c.bf16 %v707_v23, %v706_v25  ;;  %v713_v36 = vpack.c.bf16 %v709_v27, %v708_v26  ;;  %s1276_s23 = scalar_lea.vmem %s1021_s22, 2048  ;;  %p1281_p1 = scmp.lt.s32.totalorder %s1021_s22, %s1021_s22 }
 0x302   :  { %1208 = vmatprep.mubr.msk.bf16.mxu1 %vm431_vm1, %v710_v30  ;;  %v837_v14 = vshrl.u32 %v836_v13, 7  ;;  %p1277_p0 = scmp.ne.s32.totalorder %s1021_s22, %s1276_s23  ;;  %p1282_p2 = scmp.lt.s32.totalorder %s1276_s23, %s1276_s23 }
 0x303   :  { %1209 = vmatmul.mubr.msk.bf16.vlgmr.msra.gmra.mrb[8].mxu1 %vm431_vm1, %v711_v32 }
 0x304   :  { %1212 = vmatprep.mubr.msk.bf16.mxu1 %vm431_vm1, %v712_v35  ;;  %927 = vmatpush1.bf16.msra.mxu1 %v1250_v31  ;;  %v838_v15 = vsub.s32 0, %v837_v14  ;;  %v842_v17 = vsub.s32 1, %v837_v14  ;;  %p1283_p3 = por %p1282_p2, %p1281_p1 }
 0x305   :  { %928 = vmatprep.subr.bf16.mxu1 %v1255_v37 }
 0x306   :  { %v839_v18 = vrot.slane %v1031_v16, %v838_v15  ;;  %v843_v19 = vrot.slane %v1031_v16, %v842_v17  ;;  %p1284_p4 = pnand %p1283_p3, %p1277_p0 }
 0x308   :  { %929 = vmatpush1.bf16.msra.mxu1 %v1253_v38 }
 0x309   :  { %930 = vmatprep.subr.bf16.mxu1 %v1258_v39 }
 0x30b   :  { %1213 = vmatmul.mubr.msk.bf16.gmra.mrb[12].mxu1 %vm431_vm1, %v713_v36 }
 0x30c   :  { %931 = vmatpush1.bf16.msra.mxu1 %v1256_v40  ;;  %958 = vmatprep.mubr.bf16.mxu1 %v1300_v28 }
 0x30d   :  { %932 = vmatprep.subr.bf16.mxu1 %v1261_v41 }
 0x310   :  { %933 = vmatpush1.bf16.msra.mxu1 %v1259_v42 }
 0x311   :  { %934 = vmatprep.subr.bf16.mxu1 %v1264_v43 }
 0x314   :  { %935 = vmatpush1.bf16.msra.mxu1 %v1262_v44 }
 0x315   :  { %936 = vmatprep.subr.bf16.mxu1 %v1267_v45 }
 0x318   :  { %937 = vmatpush1.bf16.msra.mxu1 %v1265_v29 }
 0x319   :  { %938 = vmatprep.subr.bf16.mxu1 %v1270_v46 }
 0x31c   :  { %939 = vmatpush1.bf16.msra.mxu1 %v1268_v34 }
 0x31d   :  { %940 = vmatprep.subr.bf16.mxu1 %v1273_v47 }
 0x320   :  { %941 = vmatpush1.bf16.msra.mxu1 %v1271_v48 }
 0x3d6   :  { %v1210_v49 = vpop.f32.mrb[8].mxu1 }
 0x3d7   :  { %v785_v50 = vadd.f32 %v1210_v49, %v29_v33  ;;  %v776_v51 = vpop.f32.mrb[9].mxu1 }
 0x3d8   :  { %v777_v52 = vadd.f32 %v776_v51, %v29_v33  ;;  %v1211_v53 = vpop.f32.mrb[10].mxu1 }
 0x3d9   :  { %v788_v54 = vadd.f32 %v1211_v53, %v29_v33  ;;  %v779_v55 = vpop.f32.mrb[11].mxu1  ;;  %v809_v57 = vmax.f32 %v785_v50, 0.0 }
 0x3da   :  { %v780_v56 = vadd.f32 %v779_v55, %v29_v33  ;;  %v807_v59 = vmax.f32 %v777_v52, 0.0 }
 0x3db   :  { %v810_v58 = vmax.f32 %v788_v54, 0.0 }
 0x3dc   :  { %v808_v60 = vmax.f32 %v780_v56, 0.0 }
 0x3dd   :  { %v816_v61 = vpack.c.bf16 %v810_v58, %v809_v57 }
 0x3de   :  { %v815_v62 = vpack.c.bf16 %v808_v60, %v807_v59  ;;  %v1214_v63 = vpop.f32.mrb[12].mxu1 }
 0x3df   :  { %v801_v0 = vadd.f32 %v1214_v63, %v29_v33  ;;  %v792_v1 = vpop.f32.mrb[13].mxu1 }
 0x3e0   :  { %v793_v2 = vadd.f32 %v792_v1, %v29_v33  ;;  %v1215_v3 = vpop.f32.mrb[14].mxu1  ;;  %959 = vmatmul.mubr.bf16.vlgmr.msra.gmra.mrb[16].mxu1 %v815_v62 }
 0x3e1   :  { %v804_v4 = vadd.f32 %v1215_v3, %v29_v33  ;;  %v795_v5 = vpop.f32.mrb[15].mxu1  ;;  %968 = vmatprep.mubr.bf16.mxu1 %v1300_v28  ;;  %v813_v7 = vmax.f32 %v801_v0, 0.0 }
 0x3e2   :  { %v796_v6 = vadd.f32 %v795_v5, %v29_v33  ;;  %v811_v9 = vmax.f32 %v793_v2, 0.0 }
 0x3e3   :  { %v814_v8 = vmax.f32 %v804_v4, 0.0 }
 0x3e4   :  { %v812_v10 = vmax.f32 %v796_v6, 0.0 }
 0x3e5   :  { %v818_v11 = vpack.c.bf16 %v814_v8, %v813_v7 }
 0x3e6   :  { %v817_v12 = vpack.c.bf16 %v812_v10, %v811_v9 }
 0x3e8   :  { %969 = vmatmul.mubr.bf16.gmra.mrb[20].mxu1 %v816_v61 }
 0x3e9   :  { %978 = vmatprep.mubr.bf16.mxu1 %v1300_v28 }
 0x3f0   :  { %979 = vmatmul.mubr.bf16.gmra.mrb[24].mxu1 %v817_v12 }
 0x3f1   :  { %988 = vmatprep.mubr.bf16.mxu1 %v1300_v28 }
 0x3f8   :  { %989 = vmatmul.mubr.bf16.gmra.mrb[28].mxu1 %v818_v11 }
 0x4b3   :  { %v960_v20 = vpop.f32.mrb[16].mxu1 }
 0x4b4   :  { %v961_v21 = vadd.f32 %v960_v20, %v839_v18  ;;  %v962_v22 = vpop.f32.mrb[17].mxu1 }
 0x4b5   :  { %v963_v23 = vadd.f32 %v962_v22, %v843_v19  ;;  %v964_v24 = vpop.f32.mrb[18].mxu1 }
 0x4b6   :  { %999 = vst [vmem:[#allocation2] sm:$0xff] %v961_v21  ;;  %v965_v25 = vadd.f32 %v964_v24, %v839_v18  ;;  %v966_v26 = vpop.f32.mrb[19].mxu1 }
 0x4b7   :  { %1000 = vst [vmem:[#allocation2 + $0x8] sm:$0xff] %v963_v23  ;;  %v967_v27 = vadd.f32 %v966_v26, %v843_v19 }
 0x4b8   :  { %1001 = vst [vmem:[#allocation2 + $0x10] sm:$0xff] %v965_v25 }
 0x4b9   :  { %1002 = vst [vmem:[#allocation2 + $0x18] sm:$0xff] %v967_v27 }
 0x4bb   :  { %v970_v30 = vpop.f32.mrb[20].mxu1 }
 0x4bc   :  { %v971_v31 = vadd.f32 %v970_v30, %v839_v18  ;;  %v972_v32 = vpop.f32.mrb[21].mxu1 }
 0x4bd   :  { %v973_v35 = vadd.f32 %v972_v32, %v843_v19  ;;  %v974_v36 = vpop.f32.mrb[22].mxu1 }
 0x4be   :  { %1003 = vst [vmem:[#allocation2 + $0x20] sm:$0xff] %v971_v31  ;;  %v975_v37 = vadd.f32 %v974_v36, %v839_v18  ;;  %v976_v38 = vpop.f32.mrb[23].mxu1 }
 0x4bf   :  { %1004 = vst [vmem:[#allocation2 + $0x28] sm:$0xff] %v973_v35  ;;  %v977_v39 = vadd.f32 %v976_v38, %v843_v19 }
 0x4c0   :  { %1005 = vst [vmem:[#allocation2 + $0x30] sm:$0xff] %v975_v37 }
 0x4c1   :  { %1006 = vst [vmem:[#allocation2 + $0x38] sm:$0xff] %v977_v39 }
 0x4c3   :  { %v980_v40 = vpop.f32.mrb[24].mxu1 }
 0x4c4   :  { %v981_v41 = vadd.f32 %v980_v40, %v839_v18  ;;  %v982_v42 = vpop.f32.mrb[25].mxu1 }
 0x4c5   :  { %v983_v43 = vadd.f32 %v982_v42, %v843_v19  ;;  %v984_v44 = vpop.f32.mrb[26].mxu1 }
 0x4c6   :  { %1007 = vst [vmem:[#allocation2 + $0x40] sm:$0xff] %v981_v41  ;;  %v985_v45 = vadd.f32 %v984_v44, %v839_v18  ;;  %v986_v29 = vpop.f32.mrb[27].mxu1 }
 0x4c7   :  { %1008 = vst [vmem:[#allocation2 + $0x48] sm:$0xff] %v983_v43  ;;  %v987_v46 = vadd.f32 %v986_v29, %v843_v19 }
 0x4c8   :  { %1009 = vst [vmem:[#allocation2 + $0x50] sm:$0xff] %v985_v45 }
 0x4c9   :  { %1010 = vst [vmem:[#allocation2 + $0x58] sm:$0xff] %v987_v46 }
 0x4cb   :  { %v990_v34 = vpop.f32.mrb[28].mxu1 }
 0x4cc   :  { %v991_v47 = vadd.f32 %v990_v34, %v839_v18  ;;  %v992_v48 = vpop.f32.mrb[29].mxu1 }
 0x4cd   :  { %v993_v28 = vadd.f32 %v992_v48, %v843_v19  ;;  %v994_v33 = vpop.f32.mrb[30].mxu1 }
 0x4ce   :  { %1011 = vst [vmem:[#allocation2 + $0x60] sm:$0xff] %v991_v47  ;;  %v995_v49 = vadd.f32 %v994_v33, %v839_v18  ;;  %v996_v50 = vpop.f32.mrb[31].mxu1 }
 0x4cf   :  { %1012 = vst [vmem:[#allocation2 + $0x68] sm:$0xff] %v993_v28  ;;  %v997_v51 = vadd.f32 %v996_v50, %v843_v19 }
 0x4d0   :  { %1013 = vst [vmem:[#allocation2 + $0x70] sm:$0xff] %v995_v49 }
 0x4d1   :  { %1014 = vst [vmem:[#allocation2 + $0x78] sm:$0xff] %v997_v51 }
 0x4d2   :  { %1287 = shalt.err (!%p1284_p4)
}
 0x4d3   :  { %s1288_s26 = scalar_lea.hbm %s1602_s3, 2048 }
 0x4d4   :  { %p1289_p5 = scmp.ne.s32.totalorder %s1602_s3, %s1288_s26  ;;  %p1292_p6 = scmp.lt.u32.totalorder %s1288_s26, %s1602_s3 }
 0x4d6   :  { %p1294_p7 = pnand %p1292_p6, %p1289_p5 }
 0x4d8   :  { %1297 = shalt.err (!%p1294_p7)
}
 0x4d9   :  { %s1302_s4 = smov 256   ;;  %s1303_s5 = smov 16  }
 0x4da   :  { %1026 = dma.vmem_to_hbm [thread:$0]  %s1021_s22, 2048, %s1602_s3, [#allocation3], %s1302_s4, %s1302_s4, %s1303_s5  }
 0x4db   :  { %1298 = dma.done.wait [#allocation3], 2048  }
 0x4dc   :  { %1299 = vsyncadd [#allocation3], 4294965248 }
 0x4dd   :  { %1030 = vsyncpa [#allocation3], 1 }

</bundles_post_ra>
